<compile_context>
chip_gen: v5e
topology: v5e:2x2
jax: 0.10.0
libtpu: 0.0.40
codegen_flags: <defaults>
</compile_context>

<pallas_src>
import jax
import jax.numpy as jnp
import numpy as np
from jax.experimental import pallas as pl
from jax.experimental.pallas import tpu as pltpu


def diag_kernel(x_ref, w_ref, o_ref):
    # x_ref: (TB, TN), w_ref: (1, TN) -> VPU sublane-broadcast multiply.
    o_ref[...] = (x_ref[...] * w_ref[...]).astype(o_ref.dtype)


def _num_tensorcores():
    """Best-effort TensorCore count per device (megacore awareness)."""
    try:
        info = pltpu.get_tpu_info()
        for attr in ("num_cores", "core_count", "num_tensorcores"):
            v = getattr(info, attr, None)
            if v:
                return max(1, int(v))
    except Exception:
        pass
    try:
        v = getattr(jax.devices()[0], "num_cores", None)
        if v:
            return max(1, int(v))
    except Exception:
        pass
    return 1


def _target_tile_bytes():
    """Per-buffer tile budget, generation aware (scoped-VMEM defaults)."""
    try:
        kind = jax.devices()[0].device_kind.lower()
    except Exception:
        kind = ""
    # v5e: 16 MiB default scoped VMEM -> ~2 MiB tiles (4 buffers ~ 8 MiB).
    # v6e/v7x: 32 MiB default scoped VMEM -> ~4 MiB tiles (~16 MiB).
    if "v5" in kind:
        return 2 * 1024 * 1024
    return 4 * 1024 * 1024


def _choose_tiles(B, NDp, in_itemsize, out_itemsize, target_bytes, num_cores):
    per_elem = max(in_itemsize, out_itemsize)
    # Column tile: multiple of 128 lanes; use the full (padded) width if an
    # 8-sublane-deep tile of that width still fits the per-buffer budget.
    max_cols = max(128, (target_bytes // (8 * per_elem)) // 128 * 128)
    tn = NDp if NDp <= max_cols else max_cols
    # Row tile: fill the remaining budget, multiple of 8 sublanes.
    tb = max(8, (target_bytes // (tn * per_elem)) // 8 * 8)
    if tb >= B:
        tb = B  # block dim == full array dim is always legal
    col_steps = pl.cdiv(NDp, tn)
    row_steps = pl.cdiv(B, tb)
    # Megacore (v7x): enough parallel steps, evenly divisible across cores.
    # Single-TC chips (v5e/v6e) skip this: grid is a serial loop there.
    if num_cores > 1 and B >= 16:
        want_steps = max(2 * num_cores, 8)
        total = row_steps * col_steps
        if total < want_steps or total % num_cores:
            want_rows = pl.cdiv(want_steps, col_steps)
            new_tb = max(8, (B // want_rows) // 8 * 8)
            tb = min(tb, new_tb)
            row_steps = pl.cdiv(B, tb)
    return tb, tn, row_steps, col_steps


def diag_layer(x, weight, *, target_tile_bytes=None):
    """x: (B, num_et, in_dim), weight: (num_et, in_dim) -> (B, num_et, in_dim)."""
    B, NE, D = x.shape
    assert weight.shape == (NE, D)
    ND = NE * D

    # Explicit dtype promotion (x * weight); cast done inside the kernel.
    out_dtype = jnp.result_type(x.dtype, weight.dtype)

    # Lane-dense 2D layout; pad columns to a multiple of 128 so stores are
    # unmasked full-width vst (no-op when NE*D is already 128-aligned).
    NDp = ((ND + 127) // 128) * 128
    x2 = x.reshape(B, ND)
    w2 = weight.reshape(1, ND)
    if NDp != ND:
        pad = NDp - ND
        x2 = jnp.pad(x2, ((0, 0), (0, pad)))
        w2 = jnp.pad(w2, ((0, 0), (0, pad)))

    in_itemsize = jnp.dtype(x.dtype).itemsize
    w_itemsize = jnp.dtype(weight.dtype).itemsize
    out_itemsize = jnp.dtype(out_dtype).itemsize

    if target_tile_bytes is None:
        target_tile_bytes = _target_tile_bytes()
    num_cores = _num_tensorcores()

    tb, tn, row_steps, col_steps = _choose_tiles(
        B, NDp, in_itemsize, out_itemsize, target_tile_bytes, num_cores)

    # Column axis first (slow), so the weight block (index depends only on j)
    # stays resident across all row steps instead of being re-DMA'd each step.
    grid = (col_steps, row_steps)

    cost = pl.CostEstimate(
        flops=B * ND,
        transcendentals=0,
        bytes_accessed=(B * ND * in_itemsize
                        + B * ND * out_itemsize
                        + ND * w_itemsize),
    )

    out2 = pl.pallas_call(
        diag_kernel,
        out_shape=jax.ShapeDtypeStruct((B, NDp), out_dtype),
        grid_spec=pltpu.PrefetchScalarGridSpec(
            num_scalar_prefetch=0,
            grid=grid,
            in_specs=[
                pl.BlockSpec((tb, tn), lambda j, i: (i, j)),
                pl.BlockSpec((1, tn), lambda j, i: (0, j)),
            ],
            out_specs=pl.BlockSpec((tb, tn), lambda j, i: (i, j)),
        ),
        compiler_params=pltpu.CompilerParams(
            dimension_semantics=("parallel", "parallel"),
        ),
        cost_estimate=cost,
    )(x2, w2)

    if NDp != ND:
        out2 = out2[:, :ND]
    return out2.reshape(B, NE, D)


if __name__ == "__main__":
    def run_case(batch, num_et, in_dim):
        key = jax.random.PRNGKey(0)
        kx, kw = jax.random.split(key)
        # reset_parameters(): weight ~ Normal(0, 1/sqrt(in_dim))
        weight = (jax.random.normal(kw, (num_et, in_dim), dtype=jnp.float32)
                  * (1.0 / np.sqrt(in_dim)))
        x = jax.random.normal(kx, (batch, num_et, in_dim), dtype=jnp.float32)
        out = jax.block_until_ready(diag_layer(x, weight))
        ref = x * weight[None, :, :]
        np.testing.assert_allclose(np.asarray(out), np.asarray(ref),
                                   rtol=1e-6, atol=1e-6)

    # Lane-aligned case (NE*D multiple of 128).
    run_case(batch=8, num_et=4, in_dim=128)
    # Unaligned case: exercises column padding and a non-multiple-of-8 batch.
    run_case(batch=10, num_et=3, in_dim=50)

    print("KERNEL_OK")
</pallas_src>

<mosaic_0001>
module attributes {stable_mosaic.version = 11 : i64} {
  func.func @diag_kernel(%arg0: i32, %arg1: i32, %arg2: memref<8x512xf32, #tpu.memory_space<vmem>>, %arg3: memref<1x512xf32, #tpu.memory_space<vmem>>, %arg4: memref<8x512xf32, #tpu.memory_space<vmem>>) attributes {dimension_semantics = [#tpu.dimension_semantics<parallel>, #tpu.dimension_semantics<parallel>], iteration_bounds = array<i64: 1, 1>, scalar_prefetch = 0 : i64, scratch_operands = 0 : i64, tpu.core_type = #tpu.core_type<tc>, window_params = [{transform_indices = @transform_0, window_bounds = array<i64: 8, 512>}, {transform_indices = @transform_1, window_bounds = array<i64: 1, 512>}, {transform_indices = @transform_2, window_bounds = array<i64: 8, 512>}]} {
    %c0 = arith.constant 0 : index
    %c0_0 = arith.constant 0 : index
    %0 = vector.load %arg2[%c0, %c0_0] : memref<8x512xf32, #tpu.memory_space<vmem>>, vector<8x512xf32>
    %c0_1 = arith.constant 0 : index
    %c0_2 = arith.constant 0 : index
    %1 = vector.load %arg3[%c0_1, %c0_2] : memref<1x512xf32, #tpu.memory_space<vmem>>, vector<1x512xf32>
    %2 = vector.broadcast %1 : vector<1x512xf32> to vector<8x512xf32>
    %3 = arith.mulf %0, %2 : vector<8x512xf32>
    %c0_3 = arith.constant 0 : index
    %c0_4 = arith.constant 0 : index
    %4 = vector.load %arg4[%c0_3, %c0_4] : memref<8x512xf32, #tpu.memory_space<vmem>>, vector<8x512xf32>
    tpu.vector_store %arg4[%c0_3, %c0_4], %3 {strides = array<i32>} : memref<8x512xf32, #tpu.memory_space<vmem>>, vector<8x512xf32>,
    return
  }
  func.func @transform_0(%arg0: i32, %arg1: i32) -> (i32, i32) {
    %c0_i32 = arith.constant 0 : i32
    return %arg1, %arg0 : i32, i32
  }
  func.func @transform_1(%arg0: i32, %arg1: i32) -> (i32, i32) {
    %c0_i32 = arith.constant 0 : i32
    %c0_i32_0 = arith.constant 0 : i32
    return %c0_i32, %arg0 : i32, i32
  }
  func.func @transform_2(%arg0: i32, %arg1: i32) -> (i32, i32) {
    %c0_i32 = arith.constant 0 : i32
    return %arg1, %arg0 : i32, i32
  }
}

</mosaic_0001>

<bundles_post_ra>
// kernel: tpu_custom_call.1
= control target key start
LH: loop header
LB: loop body
LE: loop exit
PB: predicated region body
PF: predicated region fallthrough
CT: control target
= control target key end

     0   :  { %7 = vsyncpa [#allocation3], 0  ;;  %s188_s0 = inlined_call_operand.hbm [shape: f32[8,512], index: 0, kind: input, shape index: {}]   ;;  %s189_s1 = inlined_call_operand.hbm [shape: f32[1,512], index: 1, kind: input, shape index: {}]   ;;  %s190_s2 = inlined_call_operand.hbm [shape: f32[8,512], index: 2, kind: output, shape index: {}]  }
   0x1   :  { %8 = vsyncpa [#allocation6], 0 }
   0x2   :  { %9 = vsyncpa [#allocation4], 0  ;;  %s15_s11 = sshll.u32 %s188_s0, 4  ;;  %s161_s12 = smov [#allocation2]   ;;  %s16_s11 = int_to_ptr.hbm [resolvable:$true] %s15_s11 }
   0x3   :  { %s17_s13 = sshll.u32 %s161_s12, 4  ;;  %s26_s16 = sshll.u32 %s189_s1, 4  ;;  %s18_s13 = int_to_ptr.vmem [resolvable:$true] %s17_s13  ;;  %s27_s16 = int_to_ptr.hbm [resolvable:$true] %s26_s16 }
   0x4   :  { %20 = dma.hbm_to_vmem [thread:$0]  %s16_s11, 512, %s18_s13, [#allocation3]  }
   0x5   :  { %s162_s17 = smov [#allocation5]  }
   0x6   :  { %s28_s18 = sshll.u32 %s162_s17, 4  ;;  %s29_s18 = int_to_ptr.vmem [resolvable:$true] %s28_s18 }
   0x7   :  { %31 = dma.hbm_to_vmem [thread:$0]  %s27_s16, 64, %s29_s18, [#allocation6]  }
   0x8   :  { %155 = dma.done.wait [#allocation3], 512  }
   0x9   :  { %156 = vsyncadd [#allocation3], 4294966784 }
   0xa   :  { %157 = dma.done.wait [#allocation6], 64  }
   0xb   :  { %158 = vsyncadd [#allocation6], 4294967232  ;;  %v40_v0 = vld [vmem:[#allocation2] sm:$0xff]  ;;  %v41_v2 = vld [vmem:[#allocation2 + $0x8] sm:$0xff]  ;;  %s163_s0 = smov [#allocation7]   ;;  %s69_s21 = sshll.u32 %s190_s2, 4  ;;  %s70_s21 = int_to_ptr.hbm [resolvable:$true] %s69_s21 }
   0xc   :  { %v44_v1 = vld [vmem:[#allocation5] sm:$0xf]  ;;  %v42_v5 = vld [vmem:[#allocation2 + $0x10] sm:$0xff]  ;;  %v43_v7 = vld [vmem:[#allocation2 + $0x18] sm:$0xff]  ;;  %s67_s1 = sshll.u32 %s163_s0, 4  ;;  %s68_s1 = int_to_ptr.vmem [resolvable:$true] %s67_s1 }
   0xd   :  { %v46_v3 = vperm.slane %v44_v1, 0  ;;  %v47_v4 = vperm.slane %v44_v1, 1  ;;  %v48_v6 = vperm.slane %v44_v1, 2  ;;  %v49_v8 = vperm.slane %v44_v1, 3 }
   0xf   :  { %v54_v9 = vmul.f32 %v46_v3, %v40_v0  ;;  %v55_v10 = vmul.f32 %v47_v4, %v41_v2  ;;  %v56_v11 = vmul.f32 %v48_v6, %v42_v5  ;;  %v57_v12 = vmul.f32 %v49_v8, %v43_v7 }
  0x11   :  { %58 = vst [vmem:[#allocation7] sm:$0xff] %v54_v9 }
  0x12   :  { %59 = vst [vmem:[#allocation7 + $0x8] sm:$0xff] %v55_v10 }
  0x13   :  { %60 = vst [vmem:[#allocation7 + $0x10] sm:$0xff] %v56_v11 }
  0x14   :  { %61 = vst [vmem:[#allocation7 + $0x18] sm:$0xff] %v57_v12 }
  0x15   :  { %72 = dma.vmem_to_hbm [thread:$0]  %s68_s1, 512, %s70_s21, [#allocation4]  }
  0x16   :  { %159 = dma.done.wait [#allocation4], 512  }
  0x17   :  { %160 = vsyncadd [#allocation4], 4294966784 }
  0x18   :  { %77 = vsyncpa [#allocation3], 1 }
  0x19   :  { %78 = vsyncpa [#allocation6], 1 }
  0x1a   :  { %79 = vsyncpa [#allocation4], 1 }

</bundles_post_ra>
